<compile_context>
chip_gen: v7x
topology: tpu7x:2x2x1
jax: 0.10.0
libtpu: 0.0.40
codegen_flags: <defaults>
</compile_context>

<pallas_src>
import jax
import jax.numpy as jnp
import numpy as np
from jax.experimental import pallas as pl
from jax.experimental.pallas import tpu as pltpu

NUM_LAYERS = 3
HP = 128  # padded fused hidden width (2*feature_dim zero-padded up to one lane group)


def _round_up(x, m):
    return (x + m - 1) // m * m


# ------------------------------- kernel ------------------------------------

def recurrent_policy_kernel(feat2_ref, hid_ref, w_ref, b_ref, out_ref):
    # feat2_ref : (Bp, HP)     f32  padded duplicated features [feat | feat | 0]
    # hid_ref   : (Bp, HP)     f32  padded fused hidden state  [hid_pi | hid_vf | 0]
    # w_ref     : (HP, HP+P)   bf16 [block-diag collapsed hidden W | block-diag out W]
    # b_ref     : (1,  HP+P)   f32  [fused hidden bias | fused out bias]
    # out_ref   : (Bp, HP+P)   f32  [new fused hidden | fused latents]  (lane-dense)

    # Elementwise recurrent gate in f32 on the VPU.
    gated = feat2_ref[...] * hid_ref[...]

    # Collapsed (activation-free) Linear stack for both branches: one bf16 MXU matmul
    # with K=128 fill, f32 accumulation, f32 bias add + tanh on VPU/EUP.
    h = jnp.dot(gated.astype(w_ref.dtype), w_ref[:, :HP],
                preferred_element_type=jnp.float32) + b_ref[:, :HP]
    h = jnp.tanh(h)                               # new fused hidden state (Bp, HP)

    # Fused pi|vf output layer: second bf16 MXU matmul.
    lat = jnp.dot(h.astype(w_ref.dtype), w_ref[:, HP:],
                  preferred_element_type=jnp.float32) + b_ref[:, HP:]
    lat = jnp.tanh(lat)

    # Two full-lane (128-aligned) unmasked stores into the single fused output slab.
    out_ref[:, :HP] = h
    out_ref[:, HP:] = lat


# ------------------------------- wrapper ------------------------------------

def init_hidden_state(batch, feature_dim):
    """Fused, lane-padded recurrent state [hid_pi | hid_vf | 0] of ones -> (Bp, HP)."""
    bp = _round_up(max(batch, 1), 8)
    h = jnp.zeros((bp, HP), jnp.float32)
    return h.at[:, : 2 * feature_dim].set(1.0)


def split_hidden(hid_fused, batch, feature_dim):
    """Split the fused padded state back into (B,F) pi / vf views (rollout boundary only)."""
    return (hid_fused[:batch, :feature_dim],
            hid_fused[:batch, feature_dim:2 * feature_dim])


def recurrent_policy_forward(features, hid_fused, fused):
    """One recurrent step.

    features  : (B, F) f32
    hid_fused : (Bp, HP) f32 padded fused recurrent state (from init_hidden_state or a
                previous step -- kept fused/padded across steps, per review).
    Returns (latent_pi (1,B,P_pi), latent_vf (1,B,P_vf), new_hid_fused (Bp, HP)).
    """
    B, F = features.shape
    Bp = hid_fused.shape[0]
    P_pi, P_vf = fused["p_pi"], fused["p_vf"]
    P = P_pi + P_vf

    # Padded duplicated features (wrapper-side layout plumbing, zero in pad lanes/rows
    # so padded lanes of the recurrence stay exactly zero).
    feat2 = jnp.zeros((Bp, HP), jnp.float32)
    feat2 = feat2.at[:B, :F].set(features).at[:B, F:2 * F].set(features)

    vmem = lambda: pl.BlockSpec(memory_space=pltpu.MemorySpace.VMEM)
    bytes_accessed = (feat2.size * 4 + hid_fused.size * 4 +
                      fused["w"].size * 2 + fused["b"].size * 4 +
                      Bp * (HP + P) * 4)
    cost = pl.CostEstimate(
        flops=2 * Bp * HP * (HP + P),
        transcendentals=Bp * (HP + P),
        bytes_accessed=bytes_accessed,
    )

    out = pl.pallas_call(
        recurrent_policy_kernel,
        out_shape=jax.ShapeDtypeStruct((Bp, HP + P), jnp.float32),
        in_specs=[vmem(), vmem(), vmem(), vmem()],
        out_specs=vmem(),
        cost_estimate=cost,
    )(feat2, hid_fused, fused["w"], fused["b"])

    new_hid_fused = out[:, :HP]          # stays fused + padded for the next step
    latent = out[:B, HP:]
    latent_pi = latent[:, :P_pi]
    latent_vf = latent[:, P_pi:]
    # Match the PyTorch broadcast result shape (1, B, P).
    return latent_pi[None], latent_vf[None], new_hid_fused


# ------------------------- parameter construction ---------------------------

def _linear_params(kw, kb, fan_in, fan_out):
    # PyTorch nn.Linear default init: U(-1/sqrt(fan_in), 1/sqrt(fan_in))
    bound = 1.0 / np.sqrt(fan_in)
    w = jax.random.uniform(kw, (fan_in, fan_out), jnp.float32, -bound, bound)
    b = jax.random.uniform(kb, (1, fan_out), jnp.float32, -bound, bound)
    return w, b


def make_params(key, feature_dim, last_layer_dim_pi, last_layer_dim_vf):
    keys = jax.random.split(key, 4 * NUM_LAYERS + 4)
    it = iter(keys)
    w_pi_h, b_pi_h, w_vf_h, b_vf_h = [], [], [], []
    for _ in range(NUM_LAYERS):
        w, b = _linear_params(next(it), next(it), feature_dim, feature_dim)
        w_pi_h.append(w); b_pi_h.append(b)
    for _ in range(NUM_LAYERS):
        w, b = _linear_params(next(it), next(it), feature_dim, feature_dim)
        w_vf_h.append(w); b_vf_h.append(b)
    w_pi_o, b_pi_o = _linear_params(next(it), next(it), feature_dim, last_layer_dim_pi)
    w_vf_o, b_vf_o = _linear_params(next(it), next(it), feature_dim, last_layer_dim_vf)
    return {
        "w_pi_h": jnp.stack(w_pi_h), "b_pi_h": jnp.stack(b_pi_h),
        "w_pi_o": w_pi_o, "b_pi_o": b_pi_o,
        "w_vf_h": jnp.stack(w_vf_h), "b_vf_h": jnp.stack(b_vf_h),
        "w_vf_o": w_vf_o, "b_vf_o": b_vf_o,
    }


def _collapse_stack(w_stack, b_stack):
    """Collapse an activation-free Linear stack into one affine map (f32)."""
    W = w_stack[0]
    b = b_stack[0]
    for l in range(1, w_stack.shape[0]):
        W = W @ w_stack[l]
        b = b @ w_stack[l] + b_stack[l]
    return W, b                                   # (F,F), (1,F)


def fuse_params(params, matmul_dtype=jnp.bfloat16):
    """One-time fusion: collapse layer stacks, build zero-padded block-diag pi|vf
    weights at HP=128 lanes, and merge everything into one weight slab + one bias slab
    (4 kernel inputs total)."""
    F = params["w_pi_h"].shape[1]
    P_pi = params["w_pi_o"].shape[1]
    P_vf = params["w_vf_o"].shape[1]
    P = P_pi + P_vf
    assert 2 * F <= HP, "feature_dim too large for the fixed 128-lane fused hidden pad"

    W_pi, b_pi = _collapse_stack(params["w_pi_h"], params["b_pi_h"])
    W_vf, b_vf = _collapse_stack(params["w_vf_h"], params["b_vf_h"])

    w_h = jnp.zeros((HP, HP), jnp.float32)
    w_h = w_h.at[:F, :F].set(W_pi).at[F:2 * F, F:2 * F].set(W_vf)
    b_h = jnp.zeros((1, HP), jnp.float32)
    b_h = b_h.at[:, :F].set(b_pi).at[:, F:2 * F].set(b_vf)     # pad bias = 0 -> tanh(0)=0

    w_o = jnp.zeros((HP, P), jnp.float32)
    w_o = w_o.at[:F, :P_pi].set(params["w_pi_o"]).at[F:2 * F, P_pi:].set(params["w_vf_o"])
    b_o = jnp.concatenate([params["b_pi_o"], params["b_vf_o"]], axis=-1)

    w = jnp.concatenate([w_h, w_o], axis=-1).astype(matmul_dtype)   # (HP, HP+P) bf16
    b = jnp.concatenate([b_h, b_o], axis=-1)                        # (1,  HP+P) f32
    return {"w": w, "b": b, "p_pi": P_pi, "p_vf": P_vf}


# ------------------------------ reference -----------------------------------

def _ref_branch(features, hid, w_h, b_h, w_o, b_o):
    h = features * hid
    for l in range(NUM_LAYERS):
        h = h @ w_h[l] + b_h[l]
    h = jnp.tanh(h)
    return jnp.tanh(h @ w_o + b_o), h


if __name__ == "__main__":
    B, F = 4, 32                 # batch, feature_dim
    P_PI, P_VF = 64, 64          # last_layer_dim_pi / last_layer_dim_vf

    key = jax.random.PRNGKey(0)
    k_feat, k_params = jax.random.split(key)
    features = jax.random.normal(k_feat, (B, F), jnp.float32)
    params = make_params(k_params, F, P_PI, P_VF)
    fused = fuse_params(params)

    # hidden_state_pi / hidden_state_vf initialized to ones (as in __init__), kept in
    # the fused, padded layout across steps.
    hid = init_hidden_state(B, F)

    latent_pi, latent_vf, hid = recurrent_policy_forward(features, hid, fused)
    jax.block_until_ready((latent_pi, latent_vf, hid))

    # pure-JAX reference (full-precision, per-layer, per-branch)
    ones = jnp.ones((1, F), jnp.float32)
    ref_pi, ref_h_pi = _ref_branch(features, ones, params["w_pi_h"],
                                   params["b_pi_h"], params["w_pi_o"], params["b_pi_o"])
    ref_vf, ref_h_vf = _ref_branch(features, ones, params["w_vf_h"],
                                   params["b_vf_h"], params["w_vf_o"], params["b_vf_o"])

    assert latent_pi.shape == (1, B, P_PI) and latent_vf.shape == (1, B, P_VF)
    new_hid_pi, new_hid_vf = split_hidden(hid, B, F)

    np.testing.assert_allclose(np.asarray(latent_pi[0]), np.asarray(ref_pi),
                               rtol=2e-2, atol=2e-2)
    np.testing.assert_allclose(np.asarray(latent_vf[0]), np.asarray(ref_vf),
                               rtol=2e-2, atol=2e-2)
    np.testing.assert_allclose(np.asarray(new_hid_pi), np.asarray(ref_h_pi),
                               rtol=2e-2, atol=2e-2)
    np.testing.assert_allclose(np.asarray(new_hid_vf), np.asarray(ref_h_vf),
                               rtol=2e-2, atol=2e-2)
    # padded lanes of the recurrent state must stay exactly zero
    assert float(jnp.abs(hid[:, 2 * F:]).max()) == 0.0

    print("KERNEL_OK")
</pallas_src>

<mosaic_0001>
module attributes {stable_mosaic.version = 11 : i64} {
  func.func @recurrent_policy_kernel(%arg0: memref<8x128xf32, #tpu.memory_space<vmem>>, %arg1: memref<8x128xf32, #tpu.memory_space<vmem>>, %arg2: memref<128x256xbf16, #tpu.memory_space<vmem>>, %arg3: memref<1x256xf32, #tpu.memory_space<vmem>>, %arg4: memref<8x256xf32, #tpu.memory_space<vmem>>) attributes {dimension_semantics = [], scalar_prefetch = 0 : i64, scratch_operands = 0 : i64, tpu.core_type = #tpu.core_type<tc>} {
    %c0 = arith.constant 0 : index
    %c0_0 = arith.constant 0 : index
    %0 = vector.load %arg0[%c0, %c0_0] : memref<8x128xf32, #tpu.memory_space<vmem>>, vector<8x128xf32>
    %c0_1 = arith.constant 0 : index
    %c0_2 = arith.constant 0 : index
    %1 = vector.load %arg1[%c0_1, %c0_2] : memref<8x128xf32, #tpu.memory_space<vmem>>, vector<8x128xf32>
    %2 = arith.mulf %0, %1 : vector<8x128xf32>
    %3 = arith.truncf %2 : vector<8x128xf32> to vector<8x128xbf16>
    %c0_3 = arith.constant 0 : index
    %c0_4 = arith.constant 0 : index
    %4 = vector.load %arg2[%c0_3, %c0_4] : memref<128x256xbf16, #tpu.memory_space<vmem>>, vector<128x128xbf16>
    %cst = arith.constant dense<0.000000e+00> : vector<8x128xf32>
    %5 = tpu.matmul %3, %4, %cst {dimension_numbers = #tpu.dot_dimension_numbers<[1], [0], [0], [1], [0, 0, 1, 1], [], []>} : vector<8x128xbf16>, vector<128x128xbf16>, vector<8x128xf32> -> vector<8x128xf32>
    %c0_5 = arith.constant 0 : index
    %c0_6 = arith.constant 0 : index
    %6 = vector.load %arg3[%c0_5, %c0_6] : memref<1x256xf32, #tpu.memory_space<vmem>>, vector<1x128xf32>
    %7 = vector.broadcast %6 : vector<1x128xf32> to vector<8x128xf32>
    %8 = arith.addf %5, %7 : vector<8x128xf32>
    %9 = math.tanh %8 : vector<8x128xf32>
    %10 = arith.truncf %9 : vector<8x128xf32> to vector<8x128xbf16>
    %c0_7 = arith.constant 0 : index
    %c128 = arith.constant 128 : index
    %11 = vector.load %arg2[%c0_7, %c128] : memref<128x256xbf16, #tpu.memory_space<vmem>>, vector<128x128xbf16>
    %cst_8 = arith.constant dense<0.000000e+00> : vector<8x128xf32>
    %12 = tpu.matmul %10, %11, %cst_8 {dimension_numbers = #tpu.dot_dimension_numbers<[1], [0], [0], [1], [0, 0, 1, 1], [], []>} : vector<8x128xbf16>, vector<128x128xbf16>, vector<8x128xf32> -> vector<8x128xf32>
    %c0_9 = arith.constant 0 : index
    %c128_10 = arith.constant 128 : index
    %13 = vector.load %arg3[%c0_9, %c128_10] : memref<1x256xf32, #tpu.memory_space<vmem>>, vector<1x128xf32>
    %14 = vector.broadcast %13 : vector<1x128xf32> to vector<8x128xf32>
    %15 = arith.addf %12, %14 : vector<8x128xf32>
    %16 = math.tanh %15 : vector<8x128xf32>
    %c0_11 = arith.constant 0 : index
    %c0_12 = arith.constant 0 : index
    %17 = vector.load %arg4[%c0_11, %c0_12] : memref<8x256xf32, #tpu.memory_space<vmem>>, vector<8x128xf32>
    tpu.vector_store %arg4[%c0_11, %c0_12], %9 {strides = array<i32>} : memref<8x256xf32, #tpu.memory_space<vmem>>, vector<8x128xf32>,
    %c0_13 = arith.constant 0 : index
    %c128_14 = arith.constant 128 : index
    %18 = vector.load %arg4[%c0_13, %c128_14] : memref<8x256xf32, #tpu.memory_space<vmem>>, vector<8x128xf32>
    tpu.vector_store %arg4[%c0_13, %c128_14], %16 {strides = array<i32>} : memref<8x256xf32, #tpu.memory_space<vmem>>, vector<8x128xf32>,
    return
  }
}

</mosaic_0001>

<bundles_post_ra>
// kernel: tpu_custom_call.1
= control target key start
LH: loop header
LB: loop body
LE: loop exit
PB: predicated region body
PF: predicated region fallthrough
CT: control target
= control target key end

     0   :  { %9 = vsyncpa [#allocation3], 0  ;;  %s588_s0 = inlined_call_operand.hbm [shape: f32[8,128], index: 0, kind: input, shape index: {}]   ;;  %s589_s1 = inlined_call_operand.hbm [shape: f32[8,128], index: 1, kind: input, shape index: {}]   ;;  %s590_s2 = inlined_call_operand.hbm [shape: bf16[128,256], index: 2, kind: input, shape index: {}]   ;;  %s591_s3 = inlined_call_operand.vmem [shape: f32[1,256], index: 3, kind: input, shape index: {}]   ;;  %s592_s4 = inlined_call_operand.hbm [shape: f32[8,256], index: 4, kind: output, shape index: {}]  }
   0x1   :  { %10 = vsyncpa [#allocation6], 0 }
   0x2   :  { %11 = vsyncpa [#allocation4], 0  ;;  %s501_s15 = smov [#allocation5]   ;;  %s502_s17 = smov [#allocation2]  }
   0x3   :  { %s28_s16 = sshll.u32 %s501_s15, 4  ;;  %s18_s18 = sshll.u32 %s502_s17, 4  ;;  %s29_s16 = int_to_ptr.vmem [resolvable:$true] %s28_s16  ;;  %s19_s18 = int_to_ptr.vmem [resolvable:$true] %s18_s18 }
   0x4   :  { %s407_s21 = scalar_lea.hbm %s589_s1, 128 }
   0x5   :  { %p408_p0 = scmp.ne.s32.totalorder %s589_s1, %s407_s21  ;;  %p411_p1 = scmp.lt.u32.totalorder %s407_s21, %s589_s1 }
   0x7   :  { %p413_p2 = pnand %p411_p1, %p408_p0 }
   0x9   :  { %416 = shalt.err (!%p413_p2)
}
   0xa   :  { %s417_s26 = scalar_lea.vmem %s29_s16, 128  ;;  %p422_p4 = scmp.lt.s32.totalorder %s29_s16, %s29_s16 }
   0xb   :  { %p418_p3 = scmp.ne.s32.totalorder %s29_s16, %s417_s26  ;;  %p423_p5 = scmp.lt.s32.totalorder %s417_s26, %s417_s26 }
   0xd   :  { %p424_p6 = por %p423_p5, %p422_p4 }
   0xf   :  { %p425_p7 = pnand %p424_p6, %p418_p3 }
  0x11   :  { %428 = shalt.err (!%p425_p7)
}
  0x12   :  { %31 = dma.hbm_to_vmem [thread:$0]  %s589_s1, 128, %s29_s16, [#allocation6]  }
  0x13   :  { %s429_s5 = scalar_lea.hbm %s588_s0, 128 }
  0x14   :  { %p430_p8 = scmp.ne.s32.totalorder %s588_s0, %s429_s5  ;;  %p433_p9 = scmp.lt.u32.totalorder %s429_s5, %s588_s0 }
  0x16   :  { %p435_p10 = pnand %p433_p9, %p430_p8 }
  0x18   :  { %438 = shalt.err (!%p435_p10)
}
  0x19   :  { %s439_s10 = scalar_lea.vmem %s19_s18, 128  ;;  %p444_p12 = scmp.lt.s32.totalorder %s19_s18, %s19_s18 }
  0x1a   :  { %p440_p11 = scmp.ne.s32.totalorder %s19_s18, %s439_s10  ;;  %p445_p13 = scmp.lt.s32.totalorder %s439_s10, %s439_s10 }
  0x1c   :  { %p446_p0 = por %p445_p13, %p444_p12 }
  0x1e   :  { %p447_p1 = pnand %p446_p0, %p440_p11 }
  0x20   :  { %450 = shalt.err (!%p447_p1)
}
  0x21   :  { %21 = dma.hbm_to_vmem [thread:$0]  %s588_s0, 128, %s19_s18, [#allocation3]  }
  0x22   :  { %s503_s12 = smov [#allocation7]   ;;  %s451_s16 = scalar_lea.hbm %s590_s2, 2048 }
  0x23   :  { %s37_s13 = sshll.u32 %s503_s12, 4  ;;  %p452_p2 = scmp.ne.s32.totalorder %s590_s2, %s451_s16  ;;  %s38_s13 = int_to_ptr.vmem [resolvable:$true] %s37_s13 }
  0x24   :  { %p455_p3 = scmp.lt.u32.totalorder %s451_s16, %s590_s2 }
  0x26   :  { %p457_p4 = pnand %p455_p3, %p452_p2 }
  0x28   :  { %460 = shalt.err (!%p457_p4)
}
  0x29   :  { %s461_s22 = scalar_lea.vmem %s38_s13, 2048  ;;  %p466_p6 = scmp.lt.s32.totalorder %s38_s13, %s38_s13 }
  0x2a   :  { %p462_p5 = scmp.ne.s32.totalorder %s38_s13, %s461_s22  ;;  %p467_p7 = scmp.lt.s32.totalorder %s461_s22, %s461_s22 }
  0x2c   :  { %p468_p8 = por %p467_p7, %p466_p6 }
  0x2e   :  { %p469_p9 = pnand %p468_p8, %p462_p5 }
  0x30   :  { %472 = shalt.err (!%p469_p9)
}
  0x31   :  { %s504_s0 = smov 128   ;;  %s505_s18 = smov 8  }
  0x32   :  { %43 = dma.hbm_to_vmem [thread:$0]  %s590_s2, 2048, %s38_s13, [#allocation6], %s504_s0, %s504_s0, %s505_s18  }
  0x33   :  { %495 = dma.done.wait [#allocation3], 128  }
  0x34   :  { %496 = vsyncadd [#allocation3], 4294967168 }
  0x35   :  { %497 = dma.done.wait [#allocation6], 2176  }
  0x36   :  { %498 = vsyncadd [#allocation6], 4294965120  ;;  %v506_v0 = vmov 0.0   ;;  %vm507_vm0 = vmmov 0   ;;  %v387_v1 = vld [vmem:[#allocation7] ss:$8 sps:$4 sm:$0xff]  }
  0x37   :  { %339 = vmatprep.subr.bf16.mxu0 %v506_v0  ;;  %355 = vmatprep.mubr.msk.bf16.mxu0 %vm507_vm0, %v506_v0  ;;  %v388_v2 = vld [vmem:[#allocation7 + $0x10] ss:$8 sps:$4 sm:$0xff]   ;;  %v389_v3 = vld [vmem:[#allocation7 + $0x20] ss:$8 sps:$4 sm:$0xff]   ;;  %v395_v4 = vld [vmem:[#allocation7 + $0x4] ss:$8 sps:$4 sm:$0xff]  }
  0x38   :  { %359 = vmatprep.subr.bf16.mxu1 %v506_v0  ;;  %375 = vmatprep.mubr.msk.bf16.mxu1 %vm507_vm0, %v506_v0  ;;  %v390_v5 = vld [vmem:[#allocation7 + $0x30] ss:$8 sps:$4 sm:$0xff]   ;;  %v396_v6 = vld [vmem:[#allocation7 + $0x14] ss:$8 sps:$4 sm:$0xff]   ;;  %v391_v7 = vld [vmem:[#allocation7 + $0x40] ss:$8 sps:$4 sm:$0xff]  }
  0x39   :  { %340 = vmatpush3.bf16.msra.mxu0 %v387_v1  ;;  %360 = vmatpush3.bf16.msra.mxu1 %v395_v4  ;;  %v397_v8 = vld [vmem:[#allocation7 + $0x24] ss:$8 sps:$4 sm:$0xff]   ;;  %v392_v9 = vld [vmem:[#allocation7 + $0x50] ss:$8 sps:$4 sm:$0xff]   ;;  %v398_v10 = vld [vmem:[#allocation7 + $0x34] ss:$8 sps:$4 sm:$0xff]  }
  0x3a   :  { %341 = vmatprep.subr.bf16.mxu0 %v506_v0  ;;  %361 = vmatprep.subr.bf16.mxu1 %v506_v0  ;;  %v393_v11 = vld [vmem:[#allocation7 + $0x60] ss:$8 sps:$4 sm:$0xff]   ;;  %v56_v12 = vld [vmem:[#allocation2] sm:$0xff]  ;;  %v57_v13 = vld [vmem:[#allocation5] sm:$0xff]  ;;  %s508_s28 = smov [#allocation8]  }
  0x3b   :  { %v58_v14 = vmul.f32 %v57_v13, %v56_v12  ;;  %v394_v15 = vld [vmem:[#allocation7 + $0x70] ss:$8 sps:$4 sm:$0xff]   ;;  %v399_v17 = vld [vmem:[#allocation7 + $0x44] ss:$8 sps:$4 sm:$0xff]   ;;  %v400_v18 = vld [vmem:[#allocation7 + $0x54] ss:$8 sps:$4 sm:$0xff]  }
  0x3c   :  { %v401_v19 = vld [vmem:[#allocation7 + $0x64] ss:$8 sps:$4 sm:$0xff]   ;;  %v402_v20 = vld [vmem:[#allocation7 + $0x74] ss:$8 sps:$4 sm:$0xff]   ;;  %v303_v21 = vld [vmem:[%s591_s3] ss:$0 sm:$0xff] }
  0x3d   :  { %342 = vmatpush3.bf16.msra.mxu0 %v388_v2  ;;  %362 = vmatpush3.bf16.msra.mxu1 %v396_v6  ;;  %v59_v16 = vpack.c.bf16 %v58_v14, %v58_v14  ;;  %v312_v29 = vld [vmem:[%s591_s3 + $0x1] ss:$0 sm:$0xff]  ;;  %s293_s29 = sshll.u32 %s508_s28, 4  ;;  %s294_s29 = int_to_ptr.vmem [resolvable:$true] %s293_s29 }
  0x3e   :  { %343 = vmatprep.subr.bf16.mxu0 %v506_v0  ;;  %363 = vmatprep.subr.bf16.mxu1 %v506_v0  ;;  %s473_s30 = scalar_lea.vmem %s294_s29, 256  ;;  %p478_p11 = scmp.lt.s32.totalorder %s294_s29, %s294_s29 }
  0x3f   :  { %p474_p10 = scmp.ne.s32.totalorder %s294_s29, %s473_s30  ;;  %p479_p12 = scmp.lt.s32.totalorder %s473_s30, %s473_s30 }
  0x41   :  { %344 = vmatpush3.bf16.msra.mxu0 %v389_v3  ;;  %364 = vmatpush3.bf16.msra.mxu1 %v397_v8  ;;  %p480_p13 = por %p479_p12, %p478_p11 }
  0x42   :  { %345 = vmatprep.subr.bf16.mxu0 %v506_v0  ;;  %365 = vmatprep.subr.bf16.mxu1 %v506_v0 }
  0x43   :  { %p481_p0 = pnand %p480_p13, %p474_p10 }
  0x45   :  { %346 = vmatpush3.bf16.msra.mxu0 %v390_v5  ;;  %366 = vmatpush3.bf16.msra.mxu1 %v398_v10 }
  0x46   :  { %347 = vmatprep.subr.bf16.mxu0 %v506_v0  ;;  %367 = vmatprep.subr.bf16.mxu1 %v506_v0 }
  0x49   :  { %348 = vmatpush3.bf16.msra.mxu0 %v391_v7  ;;  %368 = vmatpush3.bf16.msra.mxu1 %v399_v17 }
  0x4a   :  { %349 = vmatprep.subr.bf16.mxu0 %v506_v0  ;;  %369 = vmatprep.subr.bf16.mxu1 %v506_v0 }
  0x4d   :  { %350 = vmatpush3.bf16.msra.mxu0 %v392_v9  ;;  %370 = vmatpush3.bf16.msra.mxu1 %v400_v18 }
  0x4e   :  { %351 = vmatprep.subr.bf16.mxu0 %v506_v0  ;;  %371 = vmatprep.subr.bf16.mxu1 %v506_v0 }
  0x51   :  { %352 = vmatpush3.bf16.msra.mxu0 %v393_v11  ;;  %372 = vmatpush3.bf16.msra.mxu1 %v401_v19 }
  0x52   :  { %353 = vmatprep.subr.bf16.mxu0 %v506_v0  ;;  %373 = vmatprep.subr.bf16.mxu1 %v506_v0 }
  0x55   :  { %354 = vmatpush3.bf16.msra.mxu0 %v394_v15  ;;  %374 = vmatpush3.bf16.msra.mxu1 %v402_v20 }
  0x58   :  { %356 = vmatmul.mubr.bf16.vlgmr.msra.gmra.mrb[0].mxu0 %v59_v16 }
 0x12b   :  { %v165_v22 = vpop.f32.mrb[0].mxu0 }
 0x12c   :  { %v166_v23 = vadd.f32 %v303_v21, %v165_v22  ;;  %v357_v24 = vpop.f32.mrb[1].mxu0 }
 0x12d   :  { %v168_v25 = vpop.f32.mrb[2].mxu0 }
 0x12e   :  { %403 = vtanh.f32 %v166_v23  ;;  %v358_v26 = vpop.f32.mrb[3].mxu0 }
 0x138   :  { %v404_v27 = vpop.eup %403 }
 0x139   :  { %285 = vst [vmem:[#allocation8] sm:$0xff] %v404_v27  ;;  %v172_v28 = vpack.c.bf16 %v404_v27, %v404_v27 }
 0x13b   :  { %376 = vmatmul.mubr.bf16.vlgmr.msra.gmra.mrb[0].mxu1 %v172_v28 }
 0x20e   :  { %v278_v30 = vpop.f32.mrb[0].mxu1 }
 0x20f   :  { %v279_v31 = vadd.f32 %v312_v29, %v278_v30  ;;  %v377_v32 = vpop.f32.mrb[1].mxu1 }
 0x210   :  { %v281_v33 = vpop.f32.mrb[2].mxu1 }
 0x211   :  { %405 = vtanh.f32 %v279_v31  ;;  %v378_v34 = vpop.f32.mrb[3].mxu1 }
 0x21b   :  { %v406_v35 = vpop.eup %405 }
 0x21c   :  { %286 = vst [vmem:[#allocation8 + $0x8] sm:$0xff] %v406_v35 }
 0x21d   :  { %484 = shalt.err (!%p481_p0)
}
 0x21e   :  { %s485_s6 = scalar_lea.hbm %s592_s4, 256 }
 0x21f   :  { %p486_p1 = scmp.ne.s32.totalorder %s592_s4, %s485_s6  ;;  %p489_p2 = scmp.lt.u32.totalorder %s485_s6, %s592_s4 }
 0x221   :  { %p491_p3 = pnand %p489_p2, %p486_p1 }
 0x223   :  { %494 = shalt.err (!%p491_p3)
}
 0x224   :  { %296 = dma.vmem_to_hbm [thread:$0]  %s294_s29, 256, %s592_s4, [#allocation4]  }
 0x225   :  { %499 = dma.done.wait [#allocation4], 256  }
 0x226   :  { %500 = vsyncadd [#allocation4], 4294967040 }
 0x227   :  { %300 = vsyncpa [#allocation3], 1 }
 0x228   :  { %301 = vsyncpa [#allocation6], 1 }
 0x229   :  { %302 = vsyncpa [#allocation4], 1 }

</bundles_post_ra>
